<compile_context>
chip_gen: v5e
topology: v5e:2x2
jax: 0.10.0
libtpu: 0.0.40
codegen_flags: <defaults>
</compile_context>

<pallas_src>
import functools
import numpy as np
import jax
import jax.numpy as jnp
from jax.experimental import pallas as pl
from jax.experimental.pallas import tpu as pltpu

NUM_CLASSES = 17
BN_EPS = 1e-5
BN_SCALE = float(1.0 / np.sqrt(1.0 + BN_EPS))   # eval BN with default stats, folded into W
CDTYPE = jnp.bfloat16                            # feature-map / weight dtype (MXU-friendly)
VMEM_LIMIT = 48 * 1024 * 1024                    # stays under v7x's 64 MiB with headroom


def _round_up(x, m):
    return ((x + m - 1) // m) * m


# ------------------------- fused GEMM + epilogue kernel -------------------------

def _matmul_epilogue_kernel(*refs, has_bias, has_res, relu):
    a_ref, b_ref = refs[0], refs[1]
    i = 2
    bias_ref = None
    res_ref = None
    if has_bias:
        bias_ref = refs[i]
        i += 1
    if has_res:
        res_ref = refs[i]
        i += 1
    o_ref = refs[i]

    y = jnp.dot(a_ref[...], b_ref[...], preferred_element_type=jnp.float32)
    if has_bias:
        y = y + bias_ref[...]
    if has_res:
        y = y + res_ref[...].astype(jnp.float32)
    if relu:
        y = jnp.maximum(y, 0.0)
    o_ref[...] = y.astype(o_ref.dtype)


def matmul_fused(a, b, *, bias=None, res=None, relu=True, out_dtype=CDTYPE):
    """out = act(a @ b [+ bias] [+ res]).  a:[M,K] bf16, b:[K,N] bf16.

    Single (K, N) weight block (fully VMEM resident) and a single M grid axis:
    A, B, bias and the residual each stream from HBM exactly once.
    """
    M, K = a.shape
    K2, N = b.shape
    assert K == K2

    Mp = _round_up(M, 8)
    if Mp > 256:
        tm = 256
        Mp = _round_up(Mp, 256)
    else:
        tm = Mp
    if Mp != M:
        a = jnp.pad(a, ((0, Mp - M), (0, 0)))
        if res is not None:
            res = jnp.pad(res, ((0, Mp - M), (0, 0)))

    in_specs = [
        pl.BlockSpec((tm, K), lambda i: (i, 0)),
        pl.BlockSpec((K, N), lambda i: (0, 0)),
    ]
    args = [a, b]
    if bias is not None:
        in_specs.append(pl.BlockSpec((1, N), lambda i: (0, 0)))
        args.append(bias.astype(jnp.float32).reshape(1, N))
    if res is not None:
        in_specs.append(pl.BlockSpec((tm, N), lambda i: (i, 0)))
        args.append(res)

    out = pl.pallas_call(
        functools.partial(_matmul_epilogue_kernel,
                          has_bias=bias is not None,
                          has_res=res is not None,
                          relu=relu),
        out_shape=jax.ShapeDtypeStruct((Mp, N), out_dtype),
        grid_spec=pltpu.PrefetchScalarGridSpec(
            num_scalar_prefetch=0,
            grid=(Mp // tm,),
            in_specs=in_specs,
            out_specs=pl.BlockSpec((tm, N), lambda i: (i, 0)),
        ),
        compiler_params=pltpu.CompilerParams(
            dimension_semantics=("parallel",),
            vmem_limit_bytes=VMEM_LIMIT),
    )(*args)
    if Mp != M:
        out = out[:M]
    return out


# ---------------- implicit-GEMM stride-1 KxK convolution kernel -----------------

def _conv_kxk_kernel(x_ref, w_ref, o_ref, acc_ref, *, kh, kw, dil, wp, m_out, relu):
    # x_ref: (1, L, tc) flattened padded input (row stride wp) for one batch element
    # w_ref: (kh, kw, tc, OC)
    # o_ref: (1, m_out, OC) ; acc_ref: (m_out, OC) f32
    k = pl.program_id(1)

    @pl.when(k == 0)
    def _():
        acc_ref[...] = jnp.zeros_like(acc_ref)

    part = None
    for ki in range(kh):
        for kj in range(kw):
            off = (ki * wp + kj) * dil           # constant row shift for this tap
            a = x_ref[0, off:off + m_out, :]
            d = jnp.dot(a, w_ref[ki, kj], preferred_element_type=jnp.float32)
            part = d if part is None else part + d
    acc_ref[...] += part

    @pl.when(k == pl.num_programs(1) - 1)
    def _():
        y = acc_ref[...]
        if relu:
            y = jnp.maximum(y, 0.0)
        o_ref[0] = y.astype(o_ref.dtype)


def _pick_channel_chunk(ic, rows, budget_bytes=8 * 1024 * 1024):
    if ic <= 128 or rows * ic * 2 <= budget_bytes:
        return ic
    for t in (512, 384, 256, 128):
        if ic % t == 0 and rows * t * 2 <= budget_bytes:
            return t
    return 128 if ic % 128 == 0 else ic


def conv2d_kxk_s1(x, w_hwio, *, dilation=1, padding=0, relu=True):
    """Stride-1 KxK conv as implicit GEMM (no im2col patch matrix in HBM)."""
    n, h, w, ic = x.shape
    kh, kw, ic2, oc = w_hwio.shape
    assert ic == ic2
    extra = 1 if kw > 1 else 0   # room for the last tap's row overhang in flat space
    xp = jnp.pad(x, ((0, 0), (padding, padding + extra), (padding, padding), (0, 0)))
    hp = h + 2 * padding          # logical padded height
    wp = w + 2 * padding          # padded width == flat row stride
    oh = hp - (kh - 1) * dilation
    ow = wp - (kw - 1) * dilation
    m_out = oh * wp               # compute full-width rows; invalid columns sliced off below
    L = (hp + extra) * wp
    xf = xp.reshape(n, L, ic)
    tc = _pick_channel_chunk(ic, L)

    out = pl.pallas_call(
        functools.partial(_conv_kxk_kernel, kh=kh, kw=kw, dil=dilation,
                          wp=wp, m_out=m_out, relu=relu),
        out_shape=jax.ShapeDtypeStruct((n, m_out, oc), x.dtype),
        grid_spec=pltpu.PrefetchScalarGridSpec(
            num_scalar_prefetch=0,
            grid=(n, ic // tc),
            in_specs=[
                pl.BlockSpec((1, L, tc), lambda b, k: (b, 0, k)),
                pl.BlockSpec((kh, kw, tc, oc), lambda b, k: (0, 0, k, 0)),
            ],
            out_specs=pl.BlockSpec((1, m_out, oc), lambda b, k: (b, 0, 0)),
            scratch_shapes=[pltpu.VMEM((m_out, oc), jnp.float32)],
        ),
        compiler_params=pltpu.CompilerParams(
            dimension_semantics=("parallel", "arbitrary"),
            vmem_limit_bytes=VMEM_LIMIT),
    )(xf, w_hwio)
    out = out.reshape(n, oh, wp, oc)[:, :, :ow, :]
    return out


# --------------------------- conv dispatch / host glue ---------------------------

def _extract_patches(x, kh, kw, stride, dilation, padding):
    """Small im2col (only used for the two stride-2 KxK convs)."""
    if padding:
        x = jnp.pad(x, ((0, 0), (padding, padding), (padding, padding), (0, 0)))
    n, h, w, c = x.shape
    oh = (h - (kh - 1) * dilation - 1) // stride + 1
    ow = (w - (kw - 1) * dilation - 1) // stride + 1
    cols = []
    for i in range(kh):
        for j in range(kw):
            sl = x[:, i * dilation:i * dilation + (oh - 1) * stride + 1:stride,
                   j * dilation:j * dilation + (ow - 1) * stride + 1:stride, :]
            cols.append(sl)
    return jnp.concatenate(cols, axis=-1), oh, ow


def conv2d(x, w_hwio, *, stride=1, dilation=1, padding=0,
           bias=None, res=None, relu=True, out_dtype=CDTYPE):
    """Conv2d (BN folded into weights) + optional bias / fused residual + ReLU."""
    kh, kw, ic, oc = w_hwio.shape
    n = x.shape[0]
    if kh == 1 and kw == 1 and padding == 0:
        xs = x[:, ::stride, ::stride, :] if stride > 1 else x
        _, oh, ow, _ = xs.shape
        a = xs.reshape(n * oh * ow, ic)
        b2 = w_hwio.reshape(ic, oc)
    elif stride == 1:
        assert bias is None and res is None
        return conv2d_kxk_s1(x, w_hwio, dilation=dilation, padding=padding, relu=relu)
    else:
        # stride-2 KxK convs only (stem 7x7/s2, layer2.0 conv2 3x3/s2): small im2col.
        patches, oh, ow = _extract_patches(x, kh, kw, stride, dilation, padding)
        a = patches.reshape(n * oh * ow, kh * kw * ic)
        b2 = w_hwio.reshape(kh * kw * ic, oc)
    res2 = res.reshape(n * oh * ow, oc) if res is not None else None
    out = matmul_fused(a, b2, bias=bias, res=res2, relu=relu, out_dtype=out_dtype)
    return out.reshape(n, oh, ow, oc)


def maxpool_3x3_s2_p1(x):
    # TODO(synk): maxpool stays as host-side slicing + max (pure data movement).
    xp = jnp.pad(x, ((0, 0), (1, 1), (1, 1), (0, 0)), constant_values=-np.inf)
    n, h, w, c = xp.shape
    oh = (h - 3) // 2 + 1
    ow = (w - 3) // 2 + 1
    out = None
    for i in range(3):
        for j in range(3):
            sl = xp[:, i:i + (oh - 1) * 2 + 1:2, j:j + (ow - 1) * 2 + 1:2, :]
            out = sl if out is None else jnp.maximum(out, sl)
    return out


# ---------------------------------- parameters -----------------------------------

class ParamInit:
    def __init__(self, seed=0):
        self.key = jax.random.PRNGKey(seed)
        self.n = 0

    def _next(self):
        self.n += 1
        return jax.random.fold_in(self.key, self.n)

    def conv(self, kh, kw, ic, oc, fold_bn=True):
        fan_in = kh * kw * ic
        w = (jax.random.normal(self._next(), (kh, kw, ic, oc), jnp.float32)
             * np.float32(np.sqrt(1.0 / fan_in)))
        if fold_bn:
            # Eval-mode BN with default params (gamma=1, beta=0, mean=0, var=1) folded in.
            w = w * np.float32(BN_SCALE)
        return w.astype(CDTYPE)

    def vec(self, n_, scale=0.01):
        return jax.random.normal(self._next(), (n_,), jnp.float32) * np.float32(scale)


def build_params(seed=0):
    init = ParamInit(seed)
    p = {'stem': init.conv(7, 7, 3, 64)}

    def make_layer(inplanes, planes, blocks, stride, dilate, cur_dilation):
        prev_dilation = cur_dilation
        if dilate:
            cur_dilation *= stride
            stride = 1
        downsample = (stride != 1) or (inplanes != planes * 4)

        def block(in_c, strd, dil, down):
            bp = {'conv1': init.conv(1, 1, in_c, planes),
                  'conv2': init.conv(3, 3, planes, planes),
                  'conv3': init.conv(1, 1, planes, planes * 4),
                  'stride': strd, 'dilation': dil}
            if down:
                bp['down'] = init.conv(1, 1, in_c, planes * 4)
            return bp

        layers = [block(inplanes, stride, prev_dilation, downsample)]
        inplanes = planes * 4
        for _ in range(1, blocks):
            layers.append(block(inplanes, 1, cur_dilation, False))
        return layers, inplanes, cur_dilation

    # ResNet-50 with replace_stride_with_dilation=[False, True, True] (output stride 8)
    inplanes, dil = 64, 1
    p['layer1'], inplanes, dil = make_layer(inplanes, 64, 3, 1, False, dil)
    p['layer2'], inplanes, dil = make_layer(inplanes, 128, 4, 2, False, dil)
    p['layer3'], inplanes, dil = make_layer(inplanes, 256, 6, 2, True, dil)
    p['layer4'], inplanes, dil = make_layer(inplanes, 512, 3, 2, True, dil)

    # ASPP (atrous rates 12, 24, 36), 2048 -> 256
    p['aspp'] = {
        'b0': init.conv(1, 1, 2048, 256),
        'b1': init.conv(3, 3, 2048, 256),
        'b2': init.conv(3, 3, 2048, 256),
        'b3': init.conv(3, 3, 2048, 256),
        'pool': init.conv(1, 1, 2048, 256),
        'proj': init.conv(1, 1, 5 * 256, 256),
    }
    # DeepLabHead tail: 3x3 conv + BN + ReLU, then 1x1 conv (with bias) -> num_classes
    p['head_conv'] = init.conv(3, 3, 256, 256)
    p['cls_w'] = init.conv(1, 1, 256, NUM_CLASSES, fold_bn=False)
    p['cls_b'] = init.vec(NUM_CLASSES)
    return p


# ------------------------------------ forward ------------------------------------

def bottleneck_fwd(x, bp):
    if 'down' in bp:
        identity = conv2d(x, bp['down'], stride=bp['stride'], relu=False)
    else:
        identity = x
    out = conv2d(x, bp['conv1'], relu=True)
    out = conv2d(out, bp['conv2'], stride=bp['stride'], dilation=bp['dilation'],
                 padding=bp['dilation'], relu=True)
    # conv3 + BN + residual add + ReLU fused in one Pallas GEMM epilogue
    out = conv2d(out, bp['conv3'], res=identity, relu=True)
    return out


def seg_model_forward(x_nchw, params):
    n, _, H, W = x_nchw.shape
    x = jnp.transpose(x_nchw, (0, 2, 3, 1)).astype(CDTYPE)   # NCHW -> NHWC, bf16

    # --- ResNet-50 backbone ---
    x = conv2d(x, params['stem'], stride=2, padding=3, relu=True)
    x = maxpool_3x3_s2_p1(x)
    for name in ('layer1', 'layer2', 'layer3', 'layer4'):
        for bp in params[name]:
            x = bottleneck_fwd(x, bp)

    # --- DeepLabHead: ASPP ---
    aspp = params['aspp']
    h, w = x.shape[1], x.shape[2]
    feats = [conv2d(x, aspp['b0'], relu=True)]
    for wkey, rate in (('b1', 12), ('b2', 24), ('b3', 36)):
        feats.append(conv2d(x, aspp[wkey], dilation=rate, padding=rate, relu=True))
    pooled = jnp.mean(x.astype(jnp.float32), axis=(1, 2), keepdims=True).astype(CDTYPE)
    pooled = conv2d(pooled, aspp['pool'], relu=True)          # AdaptiveAvgPool2d(1) branch
    pooled = jnp.broadcast_to(pooled, (n, h, w, 256))         # bilinear up from 1x1 = const
    feats.append(pooled)
    x = jnp.concatenate(feats, axis=-1)                       # (N, h, w, 1280)
    x = conv2d(x, aspp['proj'], relu=True)
    # TODO(synk): ASPP Dropout(0.5) is identity under inference semantics.

    # --- DeepLabHead tail ---
    x = conv2d(x, params['head_conv'], padding=1, relu=True)
    x = conv2d(x, params['cls_w'], bias=params['cls_b'], relu=False,
               out_dtype=jnp.float32)

    # --- F.interpolate(size=input, mode='bilinear', align_corners=False) ---
    x = jax.image.resize(x, (n, H, W, NUM_CLASSES), method='bilinear')
    return jnp.transpose(x, (0, 3, 1, 2))                     # NCHW: (N, num_classes, H, W)


if __name__ == "__main__":
    key = jax.random.PRNGKey(0)
    x = jax.random.normal(key, (2, 3, 64, 64), jnp.float32)
    params = build_params(seed=0)
    out = seg_model_forward(x, params)
    out = jax.block_until_ready(out)
    assert out.shape == (2, NUM_CLASSES, 64, 64), out.shape
    assert bool(jnp.all(jnp.isfinite(out)))
    print("KERNEL_OK")
</pallas_src>

<mosaic_0001>
module attributes {stable_mosaic.version = 11 : i64} {
  func.func @_matmul_epilogue_kernel(%arg0: i32, %arg1: memref<256x147xbf16, #tpu.memory_space<vmem>>, %arg2: memref<147x64xbf16, #tpu.memory_space<vmem>>, %arg3: memref<256x64xbf16, #tpu.memory_space<vmem>>) attributes {dimension_semantics = [#tpu.dimension_semantics<parallel>], iteration_bounds = array<i64: 8>, scalar_prefetch = 0 : i64, scratch_operands = 0 : i64, tpu.core_type = #tpu.core_type<tc>, window_params = [{transform_indices = @transform_0, window_bounds = array<i64: 256, 147>}, {pipeline_mode = #tpu.pipeline_mode<synchronous>, transform_indices = @transform_1, window_bounds = array<i64: 147, 64>}, {transform_indices = @transform_2, window_bounds = array<i64: 256, 64>}]} {
    %c0 = arith.constant 0 : index
    %c0_0 = arith.constant 0 : index
    %0 = vector.load %arg1[%c0, %c0_0] : memref<256x147xbf16, #tpu.memory_space<vmem>>, vector<256x147xbf16>
    %c0_1 = arith.constant 0 : index
    %c0_2 = arith.constant 0 : index
    %1 = vector.load %arg2[%c0_1, %c0_2] : memref<147x64xbf16, #tpu.memory_space<vmem>>, vector<147x64xbf16>
    %cst = arith.constant dense<0.000000e+00> : vector<256x64xf32>
    %2 = tpu.matmul %0, %1, %cst {dimension_numbers = #tpu.dot_dimension_numbers<[1], [0], [0], [1], [0, 0, 1, 1], [], []>} : vector<256x147xbf16>, vector<147x64xbf16>, vector<256x64xf32> -> vector<256x64xf32>
    %cst_3 = arith.constant 0.000000e+00 : f32
    %3 = vector.broadcast %cst_3 : f32 to vector<256x64xf32>
    %4 = arith.maximumf %2, %3 : vector<256x64xf32>
    %5 = arith.truncf %4 : vector<256x64xf32> to vector<256x64xbf16>
    %c0_4 = arith.constant 0 : index
    %c0_5 = arith.constant 0 : index
    %6 = vector.load %arg3[%c0_4, %c0_5] : memref<256x64xbf16, #tpu.memory_space<vmem>>, vector<256x64xbf16>
    tpu.vector_store %arg3[%c0_4, %c0_5], %5 {strides = array<i32>} : memref<256x64xbf16, #tpu.memory_space<vmem>>, vector<256x64xbf16>,
    return
  }
  func.func @transform_0(%arg0: i32) -> (i32, i32) {
    %c0_i32 = arith.constant 0 : i32
    %c0_i32_0 = arith.constant 0 : i32
    return %arg0, %c0_i32 : i32, i32
  }
  func.func @transform_1(%arg0: i32) -> (i32, i32) {
    %c0_i32 = arith.constant 0 : i32
    %c0_i32_0 = arith.constant 0 : i32
    %c0_i32_1 = arith.constant 0 : i32
    return %c0_i32, %c0_i32_0 : i32, i32
  }
  func.func @transform_2(%arg0: i32) -> (i32, i32) {
    %c0_i32 = arith.constant 0 : i32
    %c0_i32_0 = arith.constant 0 : i32
    return %arg0, %c0_i32 : i32, i32
  }
}

</mosaic_0001>

<bundles_post_ra>
// kernel: tpu_custom_call.1
= control target key start
LH: loop header
LB: loop body
LE: loop exit
PB: predicated region body
PF: predicated region fallthrough
CT: control target
= control target key end

     0   :  { %s1067_s9 = smov 0   ;;  %s1272_s0 = inlined_call_operand.vmem [shape: bf16[2048,147], index: 0, kind: input, shape index: {}]   ;;  %s1273_s1 = inlined_call_operand.vmem [shape: bf16[147,64], index: 1, kind: input, shape index: {}]   ;;  %s1274_s2 = inlined_call_operand.vmem [shape: bf16[2048,64], index: 2, kind: output, shape index: {}]  }
   0x1 LB: > { %s790_s10 = sadd.s32 4294967295, %s1049_s9   ;;  %p794_p0 = scmp.ge.s32.totalorder %s1049_s9, 1  ;;  %s1049_s9 = sphi %s1067_s9, %s12_s9  }
   0x2   : > { %p114_p1 = scmp.lt.s32.totalorder %s1049_s9, 9 }
   0x4   : > { %p115_p2 = pnand %p794_p0, %p114_p1 }
   0x5   : > { %s795_s15 = sshll.u32 (!%p115_p2), %s790_s10, 5 }
   0x6   : > { %118 = sbr.rel (%p115_p2) target bundleno = 302 (0x12e), region = 28  ;;  %p138_p3 = scmp.lt.s32.totalorder (!%p115_p2), %s795_s15, 255 }
   0xb   : > { %v1022_v0 = vld [vmem:[%s1273_s1 + $0x38] sm:$0xff]  ;;  %v201_v1 = vld [vmem:[%s1273_s1 + $0x48] sm:$0x3]  ;;  %vm452_vm0 = vcmask 1040384   ;;  %vm453_vm1 = vcmask 1041408   ;;  %v1021_v3 = vld [vmem:[%s1273_s1 + $0x30] sm:$0xff] }
   0xc   : > { %v383_v2 = vunpack.c.l.b16 %v201_v1  ;;  %459 = vmatpush.bf16.msra.mxu0 %v1022_v0  ;;  %1024 = vmatpush.bf16.msra.mxu2 %v1022_v0  ;;  %v1051_v4 = vmov 65535   ;;  %s1276_s15 = smov (!%p138_p3, %s795_s15), 255  ;;  %v1020_v9 = vld [vmem:[%s1273_s1 + $0x28] sm:$0xff]  ;;  %v1023_v10 = vld [vmem:[%s1273_s1 + $0x40] sm:$0xff]  ;;  %vm403_vm2 = vcmask 154624   ;;  %v1018_v18 = vld [vmem:[%s1273_s1 + $0x18] sm:$0xff] }
   0xd   : > { %v454_v5 = vsel %vm452_vm0, 4294967295, %v1051_v4  ;;  %s982_s20 = sshll.u32 %s1276_s15, 3  ;;  %v1019_v14 = vld [vmem:[%s1273_s1 + $0x20] sm:$0xff]  ;;  %v1017_v19 = vld [vmem:[%s1273_s1 + $0x10] sm:$0xff]  ;;  %v1016_v20 = vld [vmem:[%s1273_s1 + $0x8] sm:$0xff]  ;;  %s799_s8 = sshll.u32 %s1276_s15, 2 }
   0xe   : > { %v393_v6 = vpack.c.b16 %v383_v2, %v383_v2  ;;  %v455_v7 = vsel %vm453_vm1, %v454_v5, 0  ;;  %s1096_s25 = scalar_lea.vmem %s1272_s0, %s982_s20  ;;  %v1015_v26 = vld [vmem:[%s1273_s1] sm:$0xff]  ;;  %s1197_s12 = scalar_lea.vmem %s1274_s2, %s799_s8  ;;  %vm701_vm3 = vcmask 519168  }
   0xf   : > { %v983_v11 = vld [vmem:[%s1096_s25 + $0x4] sm:$0xf]  ;;  %v804_v12 = vld [vmem:[%s1096_s25 + $0x8] sm:$0xf0]  ;;  %v1001_v15 = vld [vmem:[%s1096_s25 + $0x94] sm:$0xf] }
  0x10   : > { %v457_v8 = vand.u32 %v455_v7, %v393_v6  ;;  %460 = vmatpush.bf16.msra.mxu0 %v1021_v3  ;;  %1025 = vmatpush.bf16.msra.mxu2 %v1021_v3  ;;  %v807_v13 = vor.u32 %v983_v11, %v804_v12  ;;  %v876_v16 = vld [vmem:[%s1096_s25 + $0x98] sm:$0xf0]  ;;  %v985_v21 = vld [vmem:[%s1096_s25 + $0x14] sm:$0xf]  ;;  %v1003_v23 = vld [vmem:[%s1096_s25 + $0xa4] sm:$0xf] }
  0x11   : > { %v879_v17 = vor.u32 %v1001_v15, %v876_v16  ;;  %v812_v22 = vld [vmem:[%s1096_s25 + $0x18] sm:$0xf0]  ;;  %v884_v24 = vld [vmem:[%s1096_s25 + $0xa8] sm:$0xf0]  ;;  %v802_v27 = vld [vmem:[%s1096_s25] sm:$0xf] }
  0x12   : > { %554 = vmatpush.bf16.msra.mxu1 %v457_v8  ;;  %1032 = vmatpush.bf16.msra.mxu3 %v457_v8  ;;  %v815_v25 = vor.u32 %v985_v21, %v812_v22  ;;  %v984_v28 = vld [vmem:[%s1096_s25 + $0x4] sm:$0xf0]  ;;  %v866_v29 = vld [vmem:[%s1096_s25 + $0x80] sm:$0xf]  ;;  %v887_v31 = vor.u32 %v1003_v23, %v884_v24  ;;  %v987_v34 = vld [vmem:[%s1096_s25 + $0x24] sm:$0xf] }
  0x13   : > { %v1000_v30 = vld [vmem:[%s1096_s25 + $0x84] sm:$0xf0]  ;;  %v803_v32 = vor.u32 %v984_v28, %v802_v27  ;;  %v820_v35 = vld [vmem:[%s1096_s25 + $0x28] sm:$0xf0]  ;;  %v1005_v36 = vld [vmem:[%s1096_s25 + $0xb4] sm:$0xf] }
  0x14   : > { %461 = vmatpush.bf16.msra.mxu0 %v1020_v9  ;;  %1026 = vmatpush.bf16.msra.mxu2 %v1020_v9  ;;  %v867_v33 = vor.u32 %v1000_v30, %v866_v29  ;;  %v892_v37 = vld [vmem:[%s1096_s25 + $0xb8] sm:$0xf0]  ;;  %v823_v38 = vor.u32 %v987_v34, %v820_v35  ;;  %v810_v39 = vld [vmem:[%s1096_s25 + $0x10] sm:$0xf]  ;;  %v986_v40 = vld [vmem:[%s1096_s25 + $0x14] sm:$0xf0] }
  0x15   : > { %v874_v41 = vld [vmem:[%s1096_s25 + $0x90] sm:$0xf]  ;;  %v1002_v42 = vld [vmem:[%s1096_s25 + $0x94] sm:$0xf0]  ;;  %v895_v43 = vor.u32 %v1005_v36, %v892_v37  ;;  %v811_v44 = vor.u32 %v986_v40, %v810_v39  ;;  %v989_v46 = vld [vmem:[%s1096_s25 + $0x34] sm:$0xf] }
  0x16   : > { %555 = vmatpush.bf16.msra.mxu1 %v1023_v10  ;;  %1033 = vmatpush.bf16.msra.mxu3 %v1023_v10  ;;  %v875_v45 = vor.u32 %v1002_v42, %v874_v41  ;;  %v828_v47 = vld [vmem:[%s1096_s25 + $0x38] sm:$0xf0]  ;;  %v1007_v48 = vld [vmem:[%s1096_s25 + $0xc4] sm:$0xf]  ;;  %v900_v49 = vld [vmem:[%s1096_s25 + $0xc8] sm:$0xf0] }
  0x17   : > { %v831_v50 = vor.u32 %v989_v46, %v828_v47  ;;  %v818_v51 = vld [vmem:[%s1096_s25 + $0x20] sm:$0xf]  ;;  %v988_v52 = vld [vmem:[%s1096_s25 + $0x24] sm:$0xf0]  ;;  %v903_v55 = vor.u32 %v1007_v48, %v900_v49  ;;  %v991_v58 = vld [vmem:[%s1096_s25 + $0x44] sm:$0xf] }
  0x18   : > { %462 = vmatpush.bf16.msra.mxu0 %v1019_v14  ;;  %1027 = vmatpush.bf16.msra.mxu2 %v1019_v14  ;;  %v882_v53 = vld [vmem:[%s1096_s25 + $0xa0] sm:$0xf]  ;;  %v1004_v54 = vld [vmem:[%s1096_s25 + $0xa4] sm:$0xf0]  ;;  %v819_v56 = vor.u32 %v988_v52, %v818_v51  ;;  %v836_v59 = vld [vmem:[%s1096_s25 + $0x48] sm:$0xf0] }
  0x19   : > { %964 = vmatmul.msk.bf16.vlgmr.msra.gmra.mxu1 %vm403_vm2, %v807_v13  ;;  %973 = vmatmul.msk.bf16.vlgmr.msra.gmra.mxu3 %vm403_vm2, %v879_v17  ;;  %v883_v57 = vor.u32 %v1004_v54, %v882_v53  ;;  %v1009_v60 = vld [vmem:[%s1096_s25 + $0xd4] sm:$0xf]  ;;  %v908_v61 = vld [vmem:[%s1096_s25 + $0xd8] sm:$0xf0]  ;;  %v839_v62 = vor.u32 %v991_v58, %v836_v59  ;;  %v826_v63 = vld [vmem:[%s1096_s25 + $0x30] sm:$0xf] }
  0x1a   : > { %v990_v0 = vld [vmem:[%s1096_s25 + $0x34] sm:$0xf0]  ;;  %v890_v1 = vld [vmem:[%s1096_s25 + $0xb0] sm:$0xf]  ;;  %v911_v3 = vor.u32 %v1009_v60, %v908_v61  ;;  %v993_v6 = vld [vmem:[%s1096_s25 + $0x54] sm:$0xf] }
  0x1b   : > { %v1006_v2 = vld [vmem:[%s1096_s25 + $0xb4] sm:$0xf0]  ;;  %v827_v4 = vor.u32 %v990_v0, %v826_v63  ;;  %v844_v7 = vld [vmem:[%s1096_s25 + $0x58] sm:$0xf0]  ;;  %v1011_v8 = vld [vmem:[%s1096_s25 + $0xe4] sm:$0xf] }
  0x1c   : > { %463 = vmatpush.bf16.msra.mxu0 %v1018_v18  ;;  %1028 = vmatpush.bf16.msra.mxu2 %v1018_v18  ;;  %v891_v5 = vor.u32 %v1006_v2, %v890_v1  ;;  %v916_v9 = vld [vmem:[%s1096_s25 + $0xe8] sm:$0xf0]  ;;  %v847_v10 = vor.u32 %v993_v6, %v844_v7  ;;  %v834_v11 = vld [vmem:[%s1096_s25 + $0x40] sm:$0xf]  ;;  %v992_v12 = vld [vmem:[%s1096_s25 + $0x44] sm:$0xf0] }
  0x1d   : > { %v898_v13 = vld [vmem:[%s1096_s25 + $0xc0] sm:$0xf]  ;;  %v1008_v14 = vld [vmem:[%s1096_s25 + $0xc4] sm:$0xf0]  ;;  %v919_v15 = vor.u32 %v1011_v8, %v916_v9  ;;  %v835_v16 = vor.u32 %v992_v12, %v834_v11  ;;  %v995_v18 = vld [vmem:[%s1096_s25 + $0x64] sm:$0xf] }
  0x1e   : > { %v899_v17 = vor.u32 %v1008_v14, %v898_v13  ;;  %v924_v21 = vld [vmem:[%s1096_s25 + $0xf8] sm:$0xf0]  ;;  %v842_v23 = vld [vmem:[%s1096_s25 + $0x50] sm:$0xf]  ;;  %v994_v24 = vld [vmem:[%s1096_s25 + $0x54] sm:$0xf0] }
  0x1f   : > { %v843_v28 = vor.u32 %v994_v24, %v842_v23  ;;  %v997_v30 = vld [vmem:[%s1096_s25 + $0x74] sm:$0xf]  ;;  %v996_v34 = vld [vmem:[%s1096_s25 + $0x64] sm:$0xf0]  ;;  %v914_v35 = vld [vmem:[%s1096_s25 + $0xe0] sm:$0xf] }
  0x20   : > { %464 = vmatpush.bf16.msra.mxu0 %v1017_v19  ;;  %1029 = vmatpush.bf16.msra.mxu2 %v1017_v19  ;;  %v852_v19 = vld [vmem:[%s1096_s25 + $0x68] sm:$0xf0]  ;;  %v1012_v36 = vld [vmem:[%s1096_s25 + $0xe4] sm:$0xf0]  ;;  %v999_v39 = vld [vmem:[%s1096_s25 + $0x84] sm:$0xf] }
  0x21   : > { %v855_v22 = vor.u32 %v995_v18, %v852_v19  ;;  %v868_v40 = vld [vmem:[%s1096_s25 + $0x88] sm:$0xf0]  ;;  %v858_v42 = vld [vmem:[%s1096_s25 + $0x70] sm:$0xf]  ;;  %v1014_v46 = vld [vmem:[%s1096_s25 + $0xf4] sm:$0xf0] }
  0x22   : > { %v871_v41 = vor.u32 %v999_v39, %v868_v40 }
  0x24   : > { %465 = vmatpush.bf16.msra.mxu0 %v1016_v20  ;;  %1030 = vmatpush.bf16.msra.mxu2 %v1016_v20  ;;  %v1013_v20 = vld [vmem:[%s1096_s25 + $0xf4] sm:$0xf] }
  0x25   : > { %v927_v27 = vor.u32 %v1013_v20, %v924_v21 }
  0x28   : > { %466 = vmatpush.bf16.msra.mxu0 %v1015_v26  ;;  %1031 = vmatpush.bf16.msra.mxu2 %v1015_v26  ;;  %v1010_v26 = vld [vmem:[%s1096_s25 + $0xd4] sm:$0xf0] }
  0x29   : > { %965 = vmatmul.msk.bf16.gmra.mxu1 %vm403_vm2, %v815_v25  ;;  %974 = vmatmul.msk.bf16.gmra.mxu3 %vm403_vm2, %v887_v31  ;;  %v906_v25 = vld [vmem:[%s1096_s25 + $0xd0] sm:$0xf]  ;;  %v860_v31 = vld [vmem:[%s1096_s25 + $0x78] sm:$0xf0] }
  0x2a   : > { %v907_v29 = vor.u32 %v1010_v26, %v906_v25 }
  0x2b   : > { %467 = vmatmul.bf16.vlgmr.msra.gmra.mxu0 %v803_v32  ;;  %507 = vmatmul.bf16.vlgmr.msra.gmra.mxu2 %v867_v33  ;;  %v863_v32 = vor.u32 %v997_v30, %v860_v31  ;;  %v850_v33 = vld [vmem:[%s1096_s25 + $0x60] sm:$0xf] }
  0x2c   : > { %v851_v37 = vor.u32 %v996_v34, %v850_v33 }
  0x39   : > { %966 = vmatmul.msk.bf16.gmra.mxu1 %vm403_vm2, %v823_v38  ;;  %975 = vmatmul.msk.bf16.gmra.mxu3 %vm403_vm2, %v895_v43  ;;  %v915_v38 = vor.u32 %v1012_v36, %v914_v35  ;;  %v998_v43 = vld [vmem:[%s1096_s25 + $0x74] sm:$0xf0] }
  0x3a   : > { %v859_v47 = vor.u32 %v998_v43, %v858_v42 }
  0x3b   : > { %472 = vmatmul.bf16.gmra.mxu0 %v811_v44  ;;  %512 = vmatmul.bf16.gmra.mxu2 %v875_v45  ;;  %v922_v45 = vld [vmem:[%s1096_s25 + $0xf0] sm:$0xf] }
  0x3c   : > { %v923_v48 = vor.u32 %v1014_v46, %v922_v45 }
  0x49   : > { %967 = vmatmul.msk.bf16.gmra.mxu1 %vm403_vm2, %v831_v50  ;;  %976 = vmatmul.msk.bf16.gmra.mxu3 %vm403_vm2, %v903_v55 }
  0x4b   : > { %477 = vmatmul.bf16.gmra.mxu0 %v819_v56  ;;  %517 = vmatmul.bf16.gmra.mxu2 %v883_v57 }
  0x59   : > { %968 = vmatmul.msk.bf16.gmra.mxu1 %vm403_vm2, %v839_v62  ;;  %977 = vmatmul.msk.bf16.gmra.mxu3 %vm403_vm2, %v911_v3 }
  0x5b   : > { %482 = vmatmul.bf16.gmra.mxu0 %v827_v4  ;;  %522 = vmatmul.bf16.gmra.mxu2 %v891_v5 }
  0x69   : > { %969 = vmatmul.msk.bf16.gmra.mxu1 %vm403_vm2, %v847_v10  ;;  %978 = vmatmul.msk.bf16.gmra.mxu3 %vm403_vm2, %v919_v15 }
  0x6b   : > { %487 = vmatmul.bf16.gmra.mxu0 %v835_v16  ;;  %527 = vmatmul.bf16.gmra.mxu2 %v899_v17 }
  0x79   : > { %970 = vmatmul.msk.bf16.gmra.mxu1 %vm403_vm2, %v855_v22  ;;  %979 = vmatmul.msk.bf16.gmra.mxu3 %vm403_vm2, %v927_v27 }
  0x7b   : > { %492 = vmatmul.bf16.gmra.mxu0 %v843_v28  ;;  %532 = vmatmul.bf16.gmra.mxu2 %v907_v29 }
  0x89   : > { %971 = vmatmul.msk.bf16.gmra.mxu1 %vm403_vm2, %v863_v32 }
  0x8b   : > { %497 = vmatmul.bf16.gmra.mxu0 %v851_v37  ;;  %537 = vmatmul.bf16.gmra.mxu2 %v915_v38 }
  0x96   : > { %v557_v44 = vpop.f32.mrf.mxu1 }
  0x99   : > { %972 = vmatmul.msk.bf16.gmra.mxu1 %vm403_vm2, %v871_v41 }
  0x9b   : > { %502 = vmatmul.bf16.gmra.mxu0 %v859_v47  ;;  %542 = vmatmul.bf16.gmra.mxu2 %v923_v48 }
  0x9c   : > { %v602_v51 = vpop.f32.mrf.mxu3 }
  0x9e   : > { %v559_v49 = vpop.f32.mrf.mxu1 }
  0xa4   : > { %v604_v58 = vpop.f32.mrf.mxu3 }
  0xa6   : > { %v562_v50 = vpop.f32.mrf.mxu1 }
  0xa8   : > { %v468_v52 = vpop.f32.mrf.mxu0 }
  0xa9   : > { %v558_v53 = vadd.f32 %v557_v44, %v468_v52 }
  0xab   : > { %v637_v54 = vmax.f32 %v558_v53, 0.0 }
  0xac   : > { %v607_v3 = vpop.f32.mrf.mxu3 }
  0xad   : > { %v669_v55 = vpack.c.bf16 %v637_v54, %v637_v54 }
  0xae   : > { %v564_v56 = vpop.f32.mrf.mxu1  ;;  %v1201_v57 = vpop.f32.mrf.mxu2 }
  0xaf   : > { %702 = vst.msk [vmem:[%s1197_s12] sm:$0xf] %vm701_vm3, %v669_v55 }
  0xb0   : > { %v470_v59 = vpop.f32.mrf.mxu0 }
  0xb1   : > { %v560_v60 = vadd.f32 %v559_v49, %v470_v59 }
  0xb3   : > { %v638_v61 = vmax.f32 %v560_v60, 0.0 }
  0xb4   : > { %v609_v13 = vpop.f32.mrf.mxu3 }
  0xb5   : > { %v670_v62 = vpack.c.bf16 %v638_v61, %v638_v61 }
  0xb6   : > { %v567_v63 = vpop.f32.mrf.mxu1  ;;  %v1205_v0 = vpop.f32.mrf.mxu2 }
  0xb7   : > { %703 = vst.msk [vmem:[%s1197_s12 + $0x4] sm:$0xf] %vm701_vm3, %v670_v62 }
  0xb8   : > { %v473_v1 = vpop.f32.mrf.mxu0 }
  0xb9   : > { %v563_v2 = vadd.f32 %v562_v50, %v473_v1 }
  0xbb   : > { %v639_v4 = vmax.f32 %v563_v2, 0.0 }
  0xbc   : > { %v612_v26 = vpop.f32.mrf.mxu3 }
  0xbd   : > { %v671_v5 = vpack.c.bf16 %v639_v4, %v639_v4 }
  0xbe   : > { %v569_v6 = vpop.f32.mrf.mxu1  ;;  %v513_v7 = vpop.f32.mrf.mxu2 }
  0xbf   : > { %704 = vst.msk [vmem:[%s1197_s12 + $0x8] sm:$0xf] %vm701_vm3, %v671_v5  ;;  %v603_v8 = vadd.f32 %v602_v51, %v513_v7 }
  0xc0   : > { %v475_v9 = vpop.f32.mrf.mxu0 }
  0xc1   : > { %v565_v10 = vadd.f32 %v564_v56, %v475_v9  ;;  %v655_v11 = vmax.f32 %v603_v8, 0.0 }
  0xc3   : > { %v640_v12 = vmax.f32 %v565_v10, 0.0  ;;  %v687_v14 = vpack.c.bf16 %v655_v11, %v655_v11 }
  0xc4   : > { %v614_v37 = vpop.f32.mrf.mxu3 }
  0xc5   : > { %v672_v15 = vpack.c.bf16 %v640_v12, %v640_v12  ;;  %720 = vst.msk [vmem:[%s1197_s12 + $0x48] sm:$0xf] %vm701_vm3, %v687_v14 }
  0xc6   : > { %v572_v16 = vpop.f32.mrf.mxu1  ;;  %v515_v17 = vpop.f32.mrf.mxu2 }
  0xc7   : > { %705 = vst.msk [vmem:[%s1197_s12 + $0xc] sm:$0xf] %vm701_vm3, %v672_v15  ;;  %v605_v18 = vadd.f32 %v604_v58, %v515_v17 }
  0xc8   : > { %v478_v19 = vpop.f32.mrf.mxu0 }
  0xc9   : > { %v568_v20 = vadd.f32 %v567_v63, %v478_v19  ;;  %v656_v21 = vmax.f32 %v605_v18, 0.0 }
  0xcb   : > { %v641_v22 = vmax.f32 %v568_v20, 0.0  ;;  %v688_v23 = vpack.c.bf16 %v656_v21, %v656_v21 }
  0xcc   : > { %v617_v50 = vpop.f32.mrf.mxu3 }
  0xcd   : > { %v673_v24 = vpack.c.bf16 %v641_v22, %v641_v22  ;;  %721 = vst.msk [vmem:[%s1197_s12 + $0x4c] sm:$0xf] %vm701_vm3, %v688_v23 }
  0xce   : > { %v574_v25 = vpop.f32.mrf.mxu1  ;;  %v518_v27 = vpop.f32.mrf.mxu2 }
  0xcf   : > { %706 = vst.msk [vmem:[%s1197_s12 + $0x10] sm:$0xf] %vm701_vm3, %v673_v24  ;;  %v608_v28 = vadd.f32 %v607_v3, %v518_v27 }
  0xd0   : > { %v480_v29 = vpop.f32.mrf.mxu0 }
  0xd1   : > { %v570_v30 = vadd.f32 %v569_v6, %v480_v29  ;;  %v657_v31 = vmax.f32 %v608_v28, 0.0 }
  0xd3   : > { %v642_v32 = vmax.f32 %v570_v30, 0.0  ;;  %v689_v33 = vpack.c.bf16 %v657_v31, %v657_v31 }
  0xd4   : > { %v619_v63 = vpop.f32.mrf.mxu3 }
  0xd5   : > { %v674_v34 = vpack.c.bf16 %v642_v32, %v642_v32  ;;  %722 = vst.msk [vmem:[%s1197_s12 + $0x50] sm:$0xf] %vm701_vm3, %v689_v33 }
  0xd6   : > { %v577_v35 = vpop.f32.mrf.mxu1  ;;  %v520_v36 = vpop.f32.mrf.mxu2 }
  0xd7   : > { %707 = vst.msk [vmem:[%s1197_s12 + $0x14] sm:$0xf] %vm701_vm3, %v674_v34  ;;  %v610_v38 = vadd.f32 %v609_v13, %v520_v36 }
  0xd8   : > { %v483_v39 = vpop.f32.mrf.mxu0 }
  0xd9   : > { %v573_v40 = vadd.f32 %v572_v16, %v483_v39  ;;  %v658_v41 = vmax.f32 %v610_v38, 0.0 }
  0xdb   : > { %v643_v42 = vmax.f32 %v573_v40, 0.0  ;;  %v690_v43 = vpack.c.bf16 %v658_v41, %v658_v41 }
  0xdc   : > { %v622_v13 = vpop.f32.mrf.mxu3 }
  0xdd   : > { %v675_v44 = vpack.c.bf16 %v643_v42, %v643_v42  ;;  %723 = vst.msk [vmem:[%s1197_s12 + $0x54] sm:$0xf] %vm701_vm3, %v690_v43 }
  0xde   : > { %v579_v45 = vpop.f32.mrf.mxu1  ;;  %v523_v46 = vpop.f32.mrf.mxu2 }
  0xdf   : > { %708 = vst.msk [vmem:[%s1197_s12 + $0x18] sm:$0xf] %vm701_vm3, %v675_v44  ;;  %v613_v47 = vadd.f32 %v612_v26, %v523_v46 }
  0xe0   : > { %v485_v48 = vpop.f32.mrf.mxu0 }
  0xe1   : > { %v575_v49 = vadd.f32 %v574_v25, %v485_v48  ;;  %v659_v51 = vmax.f32 %v613_v47, 0.0 }
  0xe3   : > { %v644_v52 = vmax.f32 %v575_v49, 0.0  ;;  %v691_v53 = vpack.c.bf16 %v659_v51, %v659_v51 }
  0xe4   : > { %v624_v24 = vpop.f32.mrf.mxu3 }
  0xe5   : > { %v676_v54 = vpack.c.bf16 %v644_v52, %v644_v52  ;;  %724 = vst.msk [vmem:[%s1197_s12 + $0x58] sm:$0xf] %vm701_vm3, %v691_v53 }
  0xe6   : > { %v582_v55 = vpop.f32.mrf.mxu1  ;;  %v525_v56 = vpop.f32.mrf.mxu2 }
  0xe7   : > { %709 = vst.msk [vmem:[%s1197_s12 + $0x1c] sm:$0xf] %vm701_vm3, %v676_v54  ;;  %v615_v58 = vadd.f32 %v614_v37, %v525_v56 }
  0xe8   : > { %v488_v59 = vpop.f32.mrf.mxu0 }
  0xe9   : > { %v578_v60 = vadd.f32 %v577_v35, %v488_v59  ;;  %v660_v61 = vmax.f32 %v615_v58, 0.0 }
  0xeb   : > { %v645_v62 = vmax.f32 %v578_v60, 0.0  ;;  %v692_v1 = vpack.c.bf16 %v660_v61, %v660_v61 }
  0xec   : > { %v627_v36 = vpop.f32.mrf.mxu3 }
  0xed   : > { %v677_v2 = vpack.c.bf16 %v645_v62, %v645_v62  ;;  %725 = vst.msk [vmem:[%s1197_s12 + $0x5c] sm:$0xf] %vm701_vm3, %v692_v1 }
  0xee   : > { %v584_v3 = vpop.f32.mrf.mxu1  ;;  %v528_v4 = vpop.f32.mrf.mxu2 }
  0xef   : > { %710 = vst.msk [vmem:[%s1197_s12 + $0x20] sm:$0xf] %vm701_vm3, %v677_v2  ;;  %v618_v5 = vadd.f32 %v617_v50, %v528_v4 }
  0xf0   : > { %v490_v6 = vpop.f32.mrf.mxu0 }
  0xf1   : > { %v580_v7 = vadd.f32 %v579_v45, %v490_v6  ;;  %v661_v8 = vmax.f32 %v618_v5, 0.0 }
  0xf3   : > { %v646_v9 = vmax.f32 %v580_v7, 0.0  ;;  %v693_v10 = vpack.c.bf16 %v661_v8, %v661_v8 }
  0xf4   : > { %v629_v48 = vpop.f32.mrf.mxu3 }
  0xf5   : > { %v678_v11 = vpack.c.bf16 %v646_v9, %v646_v9  ;;  %726 = vst.msk [vmem:[%s1197_s12 + $0x60] sm:$0xf] %vm701_vm3, %v693_v10 }
  0xf6   : > { %v587_v12 = vpop.f32.mrf.mxu1  ;;  %v530_v14 = vpop.f32.mrf.mxu2 }
  0xf7   : > { %711 = vst.msk [vmem:[%s1197_s12 + $0x24] sm:$0xf] %vm701_vm3, %v678_v11  ;;  %v620_v15 = vadd.f32 %v619_v63, %v530_v14 }
  0xf8   : > { %v493_v16 = vpop.f32.mrf.mxu0 }
  0xf9   : > { %v583_v17 = vadd.f32 %v582_v55, %v493_v16  ;;  %v662_v18 = vmax.f32 %v620_v15, 0.0 }
  0xfb   : > { %v647_v19 = vmax.f32 %v583_v17, 0.0  ;;  %v694_v20 = vpack.c.bf16 %v662_v18, %v662_v18 }
  0xfc   : > { %v632_v1 = vpop.f32.mrf.mxu3 }
  0xfd   : > { %v679_v21 = vpack.c.bf16 %v647_v19, %v647_v19  ;;  %727 = vst.msk [vmem:[%s1197_s12 + $0x64] sm:$0xf] %vm701_vm3, %v694_v20 }
  0xfe   : > { %v589_v22 = vpop.f32.mrf.mxu1  ;;  %v533_v23 = vpop.f32.mrf.mxu2 }
  0xff   : > { %712 = vst.msk [vmem:[%s1197_s12 + $0x28] sm:$0xf] %vm701_vm3, %v679_v21  ;;  %v623_v25 = vadd.f32 %v622_v13, %v533_v23 }
 0x100   : > { %v495_v26 = vpop.f32.mrf.mxu0 }
 0x101   : > { %v585_v27 = vadd.f32 %v584_v3, %v495_v26  ;;  %v663_v28 = vmax.f32 %v623_v25, 0.0 }
 0x103   : > { %v648_v29 = vmax.f32 %v585_v27, 0.0  ;;  %v695_v30 = vpack.c.bf16 %v663_v28, %v663_v28 }
 0x104   : > { %v634_v14 = vpop.f32.mrf.mxu3 }
 0x105   : > { %v680_v31 = vpack.c.bf16 %v648_v29, %v648_v29  ;;  %728 = vst.msk [vmem:[%s1197_s12 + $0x68] sm:$0xf] %vm701_vm3, %v695_v30 }
 0x106   : > { %v592_v32 = vpop.f32.mrf.mxu1  ;;  %v535_v33 = vpop.f32.mrf.mxu2 }
 0x107   : > { %713 = vst.msk [vmem:[%s1197_s12 + $0x2c] sm:$0xf] %vm701_vm3, %v680_v31  ;;  %v625_v34 = vadd.f32 %v624_v24, %v535_v33 }
 0x108   : > { %v498_v35 = vpop.f32.mrf.mxu0 }
 0x109   : > { %v588_v37 = vadd.f32 %v587_v12, %v498_v35  ;;  %v664_v38 = vmax.f32 %v625_v34, 0.0 }
 0x10b   : > { %v649_v39 = vmax.f32 %v588_v37, 0.0  ;;  %v696_v40 = vpack.c.bf16 %v664_v38, %v664_v38 }
 0x10d   : > { %v681_v41 = vpack.c.bf16 %v649_v39, %v649_v39  ;;  %729 = vst.msk [vmem:[%s1197_s12 + $0x6c] sm:$0xf] %vm701_vm3, %v696_v40 }
 0x10e   : > { %v594_v42 = vpop.f32.mrf.mxu1  ;;  %v538_v43 = vpop.f32.mrf.mxu2 }
 0x10f   : > { %714 = vst.msk [vmem:[%s1197_s12 + $0x30] sm:$0xf] %vm701_vm3, %v681_v41  ;;  %v628_v44 = vadd.f32 %v627_v36, %v538_v43 }
 0x110   : > { %v500_v45 = vpop.f32.mrf.mxu0 }
 0x111   : > { %v590_v46 = vadd.f32 %v589_v22, %v500_v45  ;;  %v665_v47 = vmax.f32 %v628_v44, 0.0 }
 0x113   : > { %v650_v49 = vmax.f32 %v590_v46, 0.0  ;;  %v697_v50 = vpack.c.bf16 %v665_v47, %v665_v47 }
 0x115   : > { %v682_v51 = vpack.c.bf16 %v650_v49, %v650_v49  ;;  %730 = vst.msk [vmem:[%s1197_s12 + $0x70] sm:$0xf] %vm701_vm3, %v697_v50 }
 0x116   : > { %v597_v52 = vpop.f32.mrf.mxu1  ;;  %v540_v54 = vpop.f32.mrf.mxu2 }
 0x117   : > { %v598_v53 = vadd.f32 %v597_v52, %v1201_v57  ;;  %715 = vst.msk [vmem:[%s1197_s12 + $0x34] sm:$0xf] %vm701_vm3, %v682_v51  ;;  %v630_v56 = vadd.f32 %v629_v48, %v540_v54 }
 0x118   : > { %v503_v58 = vpop.f32.mrf.mxu0 }
 0x119   : > { %v653_v55 = vmax.f32 %v598_v53, 0.0  ;;  %v593_v59 = vadd.f32 %v592_v32, %v503_v58  ;;  %v666_v61 = vmax.f32 %v630_v56, 0.0 }
 0x11b   : > { %v685_v60 = vpack.c.bf16 %v653_v55, %v653_v55  ;;  %v651_v62 = vmax.f32 %v593_v59, 0.0  ;;  %v698_v63 = vpack.c.bf16 %v666_v61, %v666_v61 }
 0x11d   : > { %718 = vst.msk [vmem:[%s1197_s12 + $0x40] sm:$0xf] %vm701_vm3, %v685_v60  ;;  %v683_v2 = vpack.c.bf16 %v651_v62, %v651_v62 }
 0x11e   : > { %v599_v3 = vpop.f32.mrf.mxu1  ;;  %731 = vst.msk [vmem:[%s1197_s12 + $0x74] sm:$0xf] %vm701_vm3, %v698_v63  ;;  %v543_v4 = vpop.f32.mrf.mxu2 }
 0x11f   : > { %v600_v57 = vadd.f32 %v599_v3, %v1205_v0  ;;  %716 = vst.msk [vmem:[%s1197_s12 + $0x38] sm:$0xf] %vm701_vm3, %v683_v2  ;;  %v633_v6 = vadd.f32 %v632_v1, %v543_v4 }
 0x120   : > { %v505_v7 = vpop.f32.mrf.mxu0 }
 0x121   : > { %v654_v5 = vmax.f32 %v600_v57, 0.0  ;;  %v595_v8 = vadd.f32 %v594_v42, %v505_v7  ;;  %v667_v10 = vmax.f32 %v633_v6, 0.0 }
 0x123   : > { %v686_v9 = vpack.c.bf16 %v654_v5, %v654_v5  ;;  %v652_v11 = vmax.f32 %v595_v8, 0.0  ;;  %v699_v12 = vpack.c.bf16 %v667_v10, %v667_v10 }
 0x125   : > { %719 = vst.msk [vmem:[%s1197_s12 + $0x44] sm:$0xf] %vm701_vm3, %v686_v9  ;;  %v684_v13 = vpack.c.bf16 %v652_v11, %v652_v11 }
 0x126   : > { %732 = vst.msk [vmem:[%s1197_s12 + $0x78] sm:$0xf] %vm701_vm3, %v699_v12  ;;  %v545_v0 = vpop.f32.mrf.mxu2 }
 0x127   : > { %717 = vst.msk [vmem:[%s1197_s12 + $0x3c] sm:$0xf] %vm701_vm3, %v684_v13  ;;  %v635_v15 = vadd.f32 %v634_v14, %v545_v0 }
 0x129   : > { %v668_v16 = vmax.f32 %v635_v15, 0.0 }
 0x12b   : > { %v700_v17 = vpack.c.bf16 %v668_v16, %v668_v16 }
 0x12d   : > { %733 = vst.msk [vmem:[%s1197_s12 + $0x7c] sm:$0xf] %vm701_vm3, %v700_v17 }
 0x12e PF: > { %s12_s9 = sadd.s32 1, %s1049_s9  }
 0x12f   : > { %p9_p4 = scmp.ge.s32.totalorder %s12_s9, 10  }
 0x131   :  { %11 = sbr.rel (!%p9_p4) target bundleno = 1 (0x1), region = 58 }

</bundles_post_ra>
